<compile_context>
chip_gen: v7x
topology: tpu7x:2x2x1
jax: 0.10.0
libtpu: 0.0.40
codegen_flags: <defaults>
</compile_context>

<pallas_src>
import functools

import jax
import jax.numpy as jnp
from jax import lax
from jax.experimental import pallas as pl
from jax.experimental.pallas import tpu as pltpu


_INV_SQRT2 = 0.7071067811865476


def _gelu_exact(g):
    # Exact (erf) gelu — matches torch.nn.functional.gelu default.
    return 0.5 * g * (1.0 + lax.erf(g * jnp.float32(_INV_SQRT2)))


def _geglu_split_kernel(x_ref, wh_ref, wg_ref, bh_ref, bg_ref, o_ref, acc_h, acc_g):
    """N-tiled path: two dots per K step, bias folded into accumulator init."""
    k = pl.program_id(2)

    @pl.when(k == 0)
    def _init():
        acc_h[...] = jnp.broadcast_to(bh_ref[...].astype(jnp.float32), acc_h.shape)
        acc_g[...] = jnp.broadcast_to(bg_ref[...].astype(jnp.float32), acc_g.shape)

    x = x_ref[...]  # native dtype straight to the MXU, f32 accumulation
    acc_h[...] += jnp.dot(x, wh_ref[...], preferred_element_type=jnp.float32)
    acc_g[...] += jnp.dot(x, wg_ref[...], preferred_element_type=jnp.float32)

    @pl.when(k == pl.num_programs(2) - 1)
    def _epilogue():
        o_ref[...] = (acc_h[...] * _gelu_exact(acc_g[...])).astype(o_ref.dtype)


def _geglu_fused_kernel(d_out, x_ref, w_ref, b_ref, o_ref, acc_ref):
    """Packed-weight path: one dot into a (tm, 2*d_out) accumulator, split at the end."""
    k = pl.program_id(1)

    @pl.when(k == 0)
    def _init():
        acc_ref[...] = jnp.broadcast_to(b_ref[...].astype(jnp.float32), acc_ref.shape)

    acc_ref[...] += jnp.dot(x_ref[...], w_ref[...], preferred_element_type=jnp.float32)

    @pl.when(k == pl.num_programs(1) - 1)
    def _epilogue():
        h = acc_ref[:, :d_out]
        g = acc_ref[:, d_out:]
        o_ref[...] = (h * _gelu_exact(g)).astype(o_ref.dtype)


def _round_up(a, b):
    return (a + b - 1) // b * b


def _pick_tile(dim, cap):
    """Largest 128-aligned tile <= cap dividing dim, preferring 256-aligned sizes
    (full v6e/v7x MXU passes); the whole dim when it is small or unaligned."""
    if dim <= cap or dim % 128 != 0:
        return dim
    fallback = None
    c = (min(cap, dim) // 128) * 128
    while c >= 128:
        if dim % c == 0:
            if c % 256 == 0:
                return c
            if fallback is None:
                fallback = c
        c -= 128
    return fallback if fallback is not None else dim


def _pick_tm(M, tm_target):
    """Row tile: big MXU slabs, but avoid gross padding waste when M is awkward."""
    if M <= tm_target:
        return _round_up(M, 8)
    for c in (1024, 512, 256, 128):
        if c <= tm_target and (_round_up(M, c) - M) <= M // 4:   # <=25% padding waste
            return c
    return 128


def geglu_pallas(x, weight, bias, *, tm_target=None, tn_cap=2048, tk_cap=512,
                 vmem_budget_bytes=44 << 20, vmem_limit_bytes=56 << 20):
    """x: (..., d_in); weight: (d_in, 2*d_out) (transposed nn.Linear weight); bias: (2*d_out,)."""
    d_in = x.shape[-1]
    two_d_out = weight.shape[-1]
    assert two_d_out % 2 == 0 and weight.shape[0] == d_in
    d_out = two_d_out // 2
    out_dtype = x.dtype

    lead_shape = x.shape[:-1]
    M = 1
    for s in lead_shape:
        M *= s
    x2d = x.reshape(M, d_in)

    if tm_target is None:
        tm_target = 1024 if M >= 4096 else 512

    tm = _pick_tm(M, tm_target)
    tk = _pick_tile(d_in, tk_cap)

    # Split (N-tiled) path only for large lane-aligned d_out; everything else uses
    # the fused packed-weight path (tn == d_out), which never copies the weight.
    use_split = (d_out % 128 == 0) and (d_out > tn_cap)
    tn = _pick_tile(d_out, tn_cap) if use_split else d_out

    bx = jnp.dtype(x.dtype).itemsize
    bw = jnp.dtype(weight.dtype).itemsize
    bo = jnp.dtype(out_dtype).itemsize

    def _footprint(tm_, tn_, tk_):
        # double-buffered x + both weight streams + output, plus f32 accumulator(s)
        return (2 * tm_ * tk_ * bx + 2 * tk_ * (2 * tn_) * bw
                + 2 * tm_ * tn_ * bo + 2 * tm_ * tn_ * 4)

    # Shrink tiles (tn -> tk -> tm) until the footprint fits the v7x-safe budget.
    while _footprint(tm, tn, tk) > vmem_budget_bytes:
        if use_split and tn % 256 == 0 and tn > 256:
            tn //= 2
        elif tk % 256 == 0 and tk > 256:
            tk //= 2
        elif tm % 16 == 0 and tm > 128:
            tm //= 2
        else:
            break

    M_pad = _round_up(M, tm)

    # Guarantee >=2 blocks on the parallel axes so both v7x TensorCores get work.
    m_blocks = M_pad // tm
    n_blocks = (d_out // tn) if use_split else 1
    if m_blocks * n_blocks < 2 and M_pad % 16 == 0 and tm >= 16:
        tm = M_pad // 2

    if M_pad != M:
        x2d = jnp.pad(x2d, ((0, M_pad - M), (0, 0)))

    vlim = max(vmem_limit_bytes, _footprint(tm, tn, tk) + (8 << 20))

    itemsize = lambda a: a.size * a.dtype.itemsize
    cost = pl.CostEstimate(
        flops=2 * M_pad * d_in * 2 * d_out,
        transcendentals=M_pad * d_out,
        bytes_accessed=(itemsize(x2d) + itemsize(weight) + itemsize(bias)
                        + M_pad * d_out * bo),
    )

    if use_split:
        g_off = d_out // tn   # h / gate halves selected via index_map block offsets
        b_h = bias[:d_out].reshape(1, d_out).astype(jnp.float32)
        b_g = bias[d_out:].reshape(1, d_out).astype(jnp.float32)
        grid = (M_pad // tm, d_out // tn, d_in // tk)
        out2d = pl.pallas_call(
            _geglu_split_kernel,
            out_shape=jax.ShapeDtypeStruct((M_pad, d_out), out_dtype),
            grid_spec=pltpu.PrefetchScalarGridSpec(
                num_scalar_prefetch=0,
                grid=grid,
                in_specs=[
                    pl.BlockSpec((tm, tk), lambda i, j, k: (i, k)),                   # x tile
                    pl.BlockSpec((tk, tn), lambda i, j, k: (k, j)),                   # W_h tile
                    pl.BlockSpec((tk, tn), lambda i, j, k, _g=g_off: (k, j + _g)),    # W_gate tile
                    pl.BlockSpec((1, tn), lambda i, j, k: (0, j)),                    # b_h
                    pl.BlockSpec((1, tn), lambda i, j, k: (0, j)),                    # b_gate
                ],
                out_specs=pl.BlockSpec((tm, tn), lambda i, j, k: (i, j)),
                scratch_shapes=[
                    pltpu.VMEM((tm, tn), jnp.float32),   # acc_h
                    pltpu.VMEM((tm, tn), jnp.float32),   # acc_gate
                ],
            ),
            compiler_params=pltpu.CompilerParams(
                dimension_semantics=("parallel", "parallel", "arbitrary"),
                vmem_limit_bytes=vlim,
            ),
            cost_estimate=cost,
        )(x2d, weight, weight, b_h, b_g)
    else:
        b_full = bias.reshape(1, 2 * d_out).astype(jnp.float32)
        grid = (M_pad // tm, d_in // tk)
        out2d = pl.pallas_call(
            functools.partial(_geglu_fused_kernel, d_out),
            out_shape=jax.ShapeDtypeStruct((M_pad, d_out), out_dtype),
            grid_spec=pltpu.PrefetchScalarGridSpec(
                num_scalar_prefetch=0,
                grid=grid,
                in_specs=[
                    pl.BlockSpec((tm, tk), lambda i, k: (i, k)),             # x tile
                    pl.BlockSpec((tk, 2 * d_out), lambda i, k: (k, 0)),      # packed [W_h | W_g]
                    pl.BlockSpec((1, 2 * d_out), lambda i, k: (0, 0)),       # packed bias
                ],
                out_specs=pl.BlockSpec((tm, d_out), lambda i, k: (i, 0)),
                scratch_shapes=[pltpu.VMEM((tm, 2 * d_out), jnp.float32)],
            ),
            compiler_params=pltpu.CompilerParams(
                dimension_semantics=("parallel", "arbitrary"),
                vmem_limit_bytes=vlim,
            ),
            cost_estimate=cost,
        )(x2d, weight, b_full)

    if M_pad != M:
        out2d = out2d[:M]
    return out2d.reshape(*lead_shape, d_out)


def geglu_ref(x, weight, bias):
    proj = jnp.dot(x.astype(jnp.float32), weight.astype(jnp.float32)) + bias.astype(jnp.float32)
    d_out = weight.shape[-1] // 2
    h, g = proj[..., :d_out], proj[..., d_out:]
    return (h * 0.5 * g * (1.0 + lax.erf(g / jnp.sqrt(2.0)))).astype(x.dtype)


def _make_params(key, d_in, d_out, dtype):
    k_w, k_b = jax.random.split(key)
    bound = 1.0 / jnp.sqrt(jnp.float32(d_in))
    # weight stored as (d_in, 2*d_out), i.e. nn.Linear.weight transposed.
    weight = jax.random.uniform(k_w, (d_in, 2 * d_out), minval=-bound, maxval=bound,
                                dtype=jnp.float32).astype(dtype)
    bias = jax.random.uniform(k_b, (2 * d_out,), minval=-bound, maxval=bound,
                              dtype=jnp.float32)
    return weight, bias


if __name__ == "__main__":
    key = jax.random.PRNGKey(0)
    k1, k2, k3, k4 = jax.random.split(key, 4)

    # --- Test 1: small unaligned d_out, f32 (fused packed-weight path, full-dim blocks) ---
    batch, seq, d_in, d_out = 2, 8, 32, 32
    x = jax.random.normal(k1, (batch, seq, d_in), dtype=jnp.float32)
    weight, bias = _make_params(k2, d_in, d_out, jnp.float32)
    out = geglu_pallas(x, weight, bias)
    jax.block_until_ready(out)
    ref = geglu_ref(x, weight, bias)
    assert out.shape == (batch, seq, d_out)
    assert jnp.allclose(out, ref, atol=1e-4, rtol=1e-4), "mismatch vs f32 reference (fused)"

    # --- Test 2: lane-aligned shapes, bf16 operands / f32 accumulation (fused path) ---
    batch2, seq2, d_in2, d_out2 = 2, 64, 256, 128
    x2 = jax.random.normal(k3, (batch2, seq2, d_in2), dtype=jnp.float32).astype(jnp.bfloat16)
    weight2, bias2 = _make_params(k2, d_in2, d_out2, jnp.bfloat16)
    out2 = geglu_pallas(x2, weight2, bias2)
    jax.block_until_ready(out2)
    ref2 = geglu_ref(x2, weight2, bias2)
    assert out2.shape == (batch2, seq2, d_out2)
    assert jnp.allclose(out2.astype(jnp.float32), ref2.astype(jnp.float32),
                        atol=1e-2, rtol=1e-2), "mismatch vs bf16 reference (fused)"

    # --- Test 3: N-tiled split path (force tn < d_out to exercise index_map offsets) ---
    batch3, seq3, d_in3, d_out3 = 2, 64, 256, 256
    x3 = jax.random.normal(k4, (batch3, seq3, d_in3), dtype=jnp.float32)
    weight3, bias3 = _make_params(k2, d_in3, d_out3, jnp.float32)
    out3 = geglu_pallas(x3, weight3, bias3, tn_cap=128)
    jax.block_until_ready(out3)
    ref3 = geglu_ref(x3, weight3, bias3)
    assert out3.shape == (batch3, seq3, d_out3)
    assert jnp.allclose(out3, ref3, atol=1e-3, rtol=1e-3), "mismatch vs f32 reference (split)"

    print("KERNEL_OK")
</pallas_src>

<mosaic_0001>
module attributes {stable_mosaic.version = 11 : i64} {
  func.func @_geglu_fused_kernel(%arg0: i32, %arg1: i32, %arg2: memref<8x32xf32, #tpu.memory_space<vmem>>, %arg3: memref<32x64xf32, #tpu.memory_space<vmem>>, %arg4: memref<1x64xf32, #tpu.memory_space<vmem>>, %arg5: memref<8x32xf32, #tpu.memory_space<vmem>>, %arg6: memref<8x64xf32, #tpu.memory_space<vmem>>) attributes {dimension_semantics = [#tpu.dimension_semantics<parallel>, #tpu.dimension_semantics<arbitrary>], iteration_bounds = array<i64: 2, 1>, scalar_prefetch = 0 : i64, scratch_operands = 1 : i64, tpu.core_type = #tpu.core_type<tc>, window_params = [{transform_indices = @transform_0, window_bounds = array<i64: 8, 32>}, {transform_indices = @transform_1, window_bounds = array<i64: 32, 64>}, {pipeline_mode = #tpu.pipeline_mode<synchronous>, transform_indices = @transform_2, window_bounds = array<i64: 1, 64>}, {transform_indices = @transform_3, window_bounds = array<i64: 8, 32>}]} {
    %c0_i32 = arith.constant 0 : i32
    %0 = arith.cmpi eq, %arg1, %c0_i32 : i32
    %1 = arith.extui %0 : i1 to i32
    %c0_i32_0 = arith.constant 0 : i32
    %2 = arith.cmpi ne, %1, %c0_i32_0 : i32
    scf.if %2 {
      %c0_10 = arith.constant 0 : index
      %c0_11 = arith.constant 0 : index
      %12 = vector.load %arg4[%c0_10, %c0_11] : memref<1x64xf32, #tpu.memory_space<vmem>>, vector<1x64xf32>
      %13 = vector.shape_cast %12 : vector<1x64xf32> to vector<1x64xf32>
      %14 = vector.broadcast %13 : vector<1x64xf32> to vector<8x64xf32>
      %c0_12 = arith.constant 0 : index
      %c0_13 = arith.constant 0 : index
      %15 = vector.load %arg6[%c0_12, %c0_13] : memref<8x64xf32, #tpu.memory_space<vmem>>, vector<8x64xf32>
      tpu.vector_store %arg6[%c0_12, %c0_13], %14 {strides = array<i32>} : memref<8x64xf32, #tpu.memory_space<vmem>>, vector<8x64xf32>,
    } else {
    }
    %c0 = arith.constant 0 : index
    %c0_1 = arith.constant 0 : index
    %3 = vector.load %arg6[%c0, %c0_1] : memref<8x64xf32, #tpu.memory_space<vmem>>, vector<8x64xf32>
    %c0_2 = arith.constant 0 : index
    %c0_3 = arith.constant 0 : index
    %4 = vector.load %arg2[%c0_2, %c0_3] : memref<8x32xf32, #tpu.memory_space<vmem>>, vector<8x32xf32>
    %c0_4 = arith.constant 0 : index
    %c0_5 = arith.constant 0 : index
    %5 = vector.load %arg3[%c0_4, %c0_5] : memref<32x64xf32, #tpu.memory_space<vmem>>, vector<32x64xf32>
    %cst = arith.constant dense<0.000000e+00> : vector<8x64xf32>
    %6 = tpu.matmul %4, %5, %cst {dimension_numbers = #tpu.dot_dimension_numbers<[1], [0], [0], [1], [0, 0, 1, 1], [], []>} : vector<8x32xf32>, vector<32x64xf32>, vector<8x64xf32> -> vector<8x64xf32>
    %7 = arith.addf %3, %6 : vector<8x64xf32>
    %c0_6 = arith.constant 0 : index
    %c0_7 = arith.constant 0 : index
    %8 = vector.load %arg6[%c0_6, %c0_7] : memref<8x64xf32, #tpu.memory_space<vmem>>, vector<8x64xf32>
    tpu.vector_store %arg6[%c0_6, %c0_7], %7 {strides = array<i32>} : memref<8x64xf32, #tpu.memory_space<vmem>>, vector<8x64xf32>,
    %c0_i32_8 = arith.constant 0 : i32
    %9 = arith.cmpi eq, %arg1, %c0_i32_8 : i32
    %10 = arith.extui %9 : i1 to i32
    %c0_i32_9 = arith.constant 0 : i32
    %11 = arith.cmpi ne, %10, %c0_i32_9 : i32
    scf.if %11 {
      %c0_10 = arith.constant 0 : index
      %c0_11 = arith.constant 0 : index
      %12 = vector.load %arg6[%c0_10, %c0_11] : memref<8x64xf32, #tpu.memory_space<vmem>>, vector<8x32xf32>
      %c0_12 = arith.constant 0 : index
      %c32 = arith.constant 32 : index
      %13 = vector.load %arg6[%c0_12, %c32] : memref<8x64xf32, #tpu.memory_space<vmem>>, vector<8x32xf32>
      %cst_13 = arith.constant 5.000000e-01 : f32
      %14 = vector.broadcast %cst_13 : f32 to vector<8x32xf32>
      %15 = arith.mulf %14, %13 : vector<8x32xf32>
      %cst_14 = arith.constant 0.707106769 : f32
      %16 = vector.broadcast %cst_14 : f32 to vector<8x32xf32>
      %17 = arith.mulf %13, %16 : vector<8x32xf32>
      %18 = math.erf %17 : vector<8x32xf32>
      %cst_15 = arith.constant 1.000000e+00 : f32
      %19 = vector.broadcast %cst_15 : f32 to vector<8x32xf32>
      %20 = arith.addf %19, %18 : vector<8x32xf32>
      %21 = arith.mulf %15, %20 : vector<8x32xf32>
      %22 = arith.mulf %12, %21 : vector<8x32xf32>
      %c0_16 = arith.constant 0 : index
      %c0_17 = arith.constant 0 : index
      %23 = vector.load %arg5[%c0_16, %c0_17] : memref<8x32xf32, #tpu.memory_space<vmem>>, vector<8x32xf32>
      tpu.vector_store %arg5[%c0_16, %c0_17], %22 {strides = array<i32>} : memref<8x32xf32, #tpu.memory_space<vmem>>, vector<8x32xf32>,
    } else {
    }
    return
  }
  func.func @transform_0(%arg0: i32, %arg1: i32) -> (i32, i32) {
    %c0_i32 = arith.constant 0 : i32
    return %arg0, %arg1 : i32, i32
  }
  func.func @transform_1(%arg0: i32, %arg1: i32) -> (i32, i32) {
    %c0_i32 = arith.constant 0 : i32
    %c0_i32_0 = arith.constant 0 : i32
    return %arg1, %c0_i32 : i32, i32
  }
  func.func @transform_2(%arg0: i32, %arg1: i32) -> (i32, i32) {
    %c0_i32 = arith.constant 0 : i32
    %c0_i32_0 = arith.constant 0 : i32
    %c0_i32_1 = arith.constant 0 : i32
    return %c0_i32, %c0_i32_0 : i32, i32
  }
  func.func @transform_3(%arg0: i32, %arg1: i32) -> (i32, i32) {
    %c0_i32 = arith.constant 0 : i32
    %c0_i32_0 = arith.constant 0 : i32
    return %arg0, %c0_i32 : i32, i32
  }
}

</mosaic_0001>

<bundles_post_ra>
// kernel: tpu_custom_call.1
= control target key start
LH: loop header
LB: loop body
LE: loop exit
PB: predicated region body
PF: predicated region fallthrough
CT: control target
= control target key end

     0   :  { %8 = vsyncpa [#allocation4], 0  ;;  %s961_s0 = inlined_call_operand.hbm [shape: f32[16,32], index: 0, kind: input, shape index: {}]   ;;  %s962_s1 = inlined_call_operand.hbm [shape: f32[32,64], index: 1, kind: input, shape index: {}]   ;;  %s963_s2 = inlined_call_operand.vmem [shape: f32[1,64], index: 2, kind: input, shape index: {}]   ;;  %s964_s3 = inlined_call_operand.hbm [shape: f32[16,32], index: 3, kind: output, shape index: {}]  }
   0x1   :  { %10 = vsyncpa [#allocation4 + $0x1], 0 }
   0x2   :  { %11 = vsyncpa [#allocation7], 0 }
   0x3   :  { %12 = vsyncpa [#allocation5], 0 }
   0x4   :  { %14 = vsyncpa [#allocation5 + $0x1], 0  ;;  %s736_s12 = smov 0   ;;  %s738_s13 = smov 0  }
   0x5   :  { %s740_s14 = smov 0   ;;  %s742_s15 = smov 0  }
   0x6   :  { %s744_s16 = smov 0   ;;  %s746_s17 = smov 0  }
   0x7 LB: > { %s441_s18 = sadd.s32 4294967295, %s705_s17   ;;  %s442_s19 = sadd.s32 4294967294, %s705_s17   ;;  %s705_s17 = sphi %s746_s17, %s20_s17   ;;  %s701_s16 = sphi %s744_s16, %s988_s16   ;;  %s697_s15 = sphi %s742_s15, %s987_s15   ;;  %s693_s14 = sphi %s740_s14, %s986_s14   ;;  %s689_s13 = sphi %s738_s13, %s985_s13   ;;  %s685_s12 = sphi %s736_s12, %s984_s12  }
   0x8   : > { %p54_p0 = scmp.ne.s32.totalorder %s689_s13, %s685_s12  ;;  %p770_p1 = scmp.eq.s32.totalorder %s441_s18, 0 }
   0x9   : > { %p774_p2 = scmp.eq.s32.totalorder %s441_s18, 1  ;;  %p131_p3 = scmp.eq.s32.totalorder %s442_s19, 1 }
   0xa   : > { %s969_s20 = scalar_select %p770_p1, 1, 0 }
   0xb   : > { %s970_s21 = scalar_select %p774_p2, 1, 0 }
   0xc   : > { %p780_p4 = por %p770_p1, %p54_p0  ;;  %p443_p5 = scmp.ge.s32.totalorder %s705_s17, 1 }
   0xd   : > { %p785_p6 = por %p131_p3, %p54_p0  ;;  %p138_p7 = scmp.lt.s32.totalorder %s705_s17, 3 }
   0xe   : > { %s971_s22 = scalar_select %p780_p4, 1, 0 }
   0xf   : > { %s972_s23 = scalar_select %p785_p6, 1, 0 }
  0x10   : > { %p790_p8 = pnand %p443_p5, %p138_p7  ;;  %s707_s25 = smov [#allocation6]  }
  0x11   : > { %s153_s26 = sshll.u32 %s707_s25, 4  ;;  %s32_s28 = sadd.s32 1, %s701_s16  ;;  %s154_s26 = int_to_ptr.vmem [resolvable:$true] %s153_s26 }
  0x12   : > { %s973_s24 = scalar_select %p790_p8, 1, 0 }
  0x13   : > { %p488_p9 = pneg %p790_p8  ;;  %s561_s4 = scalar_lea.hbm %s962_s1, 512 }
  0x14   : > { %p562_p12 = scmp.ne.s32.totalorder %s962_s1, %s561_s4  ;;  %p568_p5 = scmp.lt.u32.totalorder %s561_s4, %s962_s1 }
  0x15   : > { %p799_p11 = pnand %p488_p9, %p770_p1 }
  0x17   : > { %p563_p13 = pneg %p799_p11 }
  0x19   : > { %p564_p0 = pnand %p563_p13, %p562_p12 }
  0x1b   : > { %p565_p3 = pneg %p564_p0 }
  0x1d   : > { %p570_p7 = pnand %p568_p5, %p565_p3 }
  0x1f   : > { %573 = shalt.err (!%p570_p7)
}
  0x20   : > { %s574_s9 = scalar_lea.vmem %s154_s26, 512  ;;  %p582_p1 = scmp.lt.s32.totalorder %s154_s26, %s154_s26 }
  0x21   : > { %p575_p9 = scmp.ne.s32.totalorder %s154_s26, %s574_s9  ;;  %p583_p4 = scmp.lt.s32.totalorder %s574_s9, %s574_s9 }
  0x23   : > { %p577_p10 = pnand %p575_p9, %p563_p13  ;;  %p584_p8 = por %p583_p4, %p582_p1 }
  0x25   : > { %p578_p6 = pneg %p577_p10 }
  0x27   : > { %p585_p2 = pnand %p584_p8, %p578_p6 }
  0x29   : > { %588 = shalt.err (!%p585_p2)
}
  0x2a   : > { %s708_s10 = smov 128   ;;  %s709_s11 = smov 8  }
  0x2b   : > { %491 = dma.hbm_to_vmem [thread:$0]  (!%p799_p11), %s962_s1, 512, %s154_s26, [#allocation7], %s708_s10, %s708_s10, %s709_s11  }
  0x2c   : > { %p34_p1 = scmp.ge.s32.totalorder %s32_s28, 2  ;;  %s41_s25 = sadd.s32 1, %s693_s14 }
  0x2d   : > { %p48_p2 = scmp.ne.s32.totalorder %s693_s14, %s689_s13  ;;  %p49_p4 = scmp.eq.s32.totalorder %s705_s17, 0 }
  0x2e   : > { %s990_s28 = smov (%p34_p1, %s32_s28), 0  ;;  %p976_p8 = scmp.ne.s32.totalorder %s970_s21, 0 }
  0x2f   : > { %p826_p6 = por %p49_p4, %p48_p2  ;;  %s36_s27 = ssub.s32 %s701_s16, %s990_s28 }
  0x30   : > { %p832_p10 = por %p976_p8, %p48_p2  ;;  %p501_p12 = scmp.lt.s32.totalorder %s705_s17, 2 }
  0x31   : > { %p39_p11 = scmp.eq.s32.totalorder %s36_s27, 0  ;;  %s170_s26 = sand.u32 1, %s693_s14  }
  0x32   : > { %s446_s4 = sshll.u32 %s170_s26, 3  ;;  %s447_s6 = sshll.u32 %s701_s16, 7 }
  0x33   : > { %s841_s5 = scalar_select %p39_p11, %s693_s14, %s41_s25  }
  0x34   : > { %s847_s9 = scalar_lea.hbm %s961_s0, %s447_s6  ;;  %s174_s21 = scalar_lea.vmem [#allocation3], %s446_s4 }
  0x35   : > { %s182_s10 = sshll.u32 %s174_s21, 4  ;;  %p853_p13 = pnand %p501_p12, %p826_p6  ;;  %s849_s10 = int_to_ptr.vmem [resolvable:$true] %s182_s10 }
  0x36   : > { %s171_s18 = scalar_lea.sflag [#allocation4], %s170_s26  ;;  %s589_s19 = scalar_lea.hbm %s847_s9, 128 }
  0x37   : > { %p590_p0 = scmp.ne.s32.totalorder %s847_s9, %s589_s19  ;;  %p591_p3 = pneg %p853_p13 }
  0x38   : > { %s594_s4 = scalar_lea.hbm %s961_s0, 256  ;;  %p595_p9 = scmp.lt.u32.totalorder %s847_s9, %s961_s0 }
  0x39   : > { %p592_p5 = pnand %p591_p3, %p590_p0  ;;  %p596_p1 = scmp.lt.u32.totalorder %s594_s4, %s589_s19 }
  0x3a   : > { %p598_p4 = scmp.lt.u32.totalorder %s589_s19, %s847_s9 }
  0x3b   : > { %p593_p7 = pneg %p592_p5  ;;  %p597_p2 = por %p596_p1, %p595_p9 }
  0x3d   : > { %p599_p6 = por %p598_p4, %p597_p2 }
  0x3f   : > { %p600_p8 = pnand %p599_p6, %p593_p7 }
  0x41   : > { %603 = shalt.err (!%p600_p8)
}
  0x42   : > { %s604_s26 = scalar_lea.vmem %s849_s10, 128  ;;  %s710_s7 = smov [#allocation3]  }
  0x43   : > { %p605_p12 = scmp.ne.s32.totalorder %s849_s10, %s604_s26  ;;  %s609_s8 = sshll.u32 %s710_s7, 4  ;;  %s610_s8 = int_to_ptr.vmem [resolvable:$false] %s609_s8 }
  0x44   : > { %s611_s21 = scalar_lea.vmem %s610_s8, 256  ;;  %p612_p5 = scmp.lt.s32.totalorder %s849_s10, %s610_s8 }
  0x45   : > { %p607_p11 = pnand %p605_p12, %p591_p3  ;;  %p613_p9 = scmp.lt.s32.totalorder %s611_s21, %s604_s26 }
  0x47   : > { %p608_p0 = pneg %p607_p11  ;;  %p614_p1 = por %p613_p9, %p612_p5 }
  0x49   : > { %p615_p2 = pnand %p614_p1, %p608_p0 }
  0x4b   : > { %618 = shalt.err (!%p615_p2)
}
  0x4c   : > { %495 = dma.hbm_to_vmem [thread:$0]  (!%p853_p13), %s847_s9, 128, %s849_s10, %s171_s18  }
  0x4d   : > { %p979_p7 = scmp.ne.s32.totalorder %s973_s24, 0 }
  0x4e   : > { %s885_s19 = sand.u32 (!%p979_p7), 1, %s689_s13   ;;  %p980_p3 = scmp.ne.s32.totalorder (!%p979_p7), %s971_s22, 0 }
  0x4f   : > { %191 = sbr.rel (%p979_p7) target bundleno = 471 (0x1d7), region = 32  ;;  %s449_s25 = sshll.u32 (!%p979_p7), %s885_s19, 3 }
  0x50   : > { %s194_s27 = scalar_lea.sflag (!%p979_p7), [#allocation4], %s885_s19  ;;  %s197_s4 = scalar_lea.vmem (!%p979_p7), [#allocation3], %s449_s25 }
  0x56   : > { %672 = dma.done.wait (%p980_p3), %s194_s27, 128  }
  0x57   : > { %674 = vsyncadd (%p980_p3), %s194_s27, 4294967168  ;;  %p981_p13 = scmp.ne.s32.totalorder %s969_s20, 0 }
  0x59   : > { %676 = dma.done.wait (%p981_p13), [#allocation7], 512  }
  0x5a   : > { %678 = vsyncadd (%p981_p13), [#allocation7], 4294966784  ;;  %v711_v0 = vmov 0.0|0.0   ;;  %vm712_vm0 = vmmov 0   ;;  %v713_v1 = vmov 0.0   ;;  %vm236_vm1 = vcmask 523264  }
  0x5b   : > { %474 = vmatprep.subr.bf16.mxu0 %v711_v0  ;;  %471 = vmatprep.mubr.msk.f32.mxu0 %vm712_vm0, %v713_v1  ;;  %v240_v2 = vld [vmem:[#allocation6] sm:$0xff]  ;;  %v241_v3 = vld [vmem:[#allocation6 + $0x8] sm:$0xff]  ;;  %v242_v4 = vld [vmem:[#allocation6 + $0x10] sm:$0xff]  ;;  %vm244_vm2 = vcmask 261120   ;;  %s714_s20 = smov 96   ;;  %s455_s9 = sshll.u32 %s697_s15, 7 }
  0x5c   : > { %v475_v5 = vpack.c.bf16 %v241_v3, %v240_v2  ;;  %v243_v6 = vld [vmem:[#allocation6 + $0x18] sm:$0xff]  ;;  %v452_v7 = vld [vmem:[%s963_s2] ss:$0 sm:$0xff]  ;;  %s223_s10 = scalar_lea.vmem [#allocation8], %s449_s25  ;;  %s911_s6 = scalar_lea.hbm %s964_s3, %s455_s9 }
  0x5d   : > { %237 = vst.msk [vmem:[#allocation2] sm:$0xff] %vm236_vm1, %v452_v7  ;;  %v478_v8 = vpack.c.bf16 %v243_v6, %v242_v4  ;;  %v239_v9 = vld [vmem:[%s197_s4] sm:$0xff]  ;;  %s350_s11 = sshll.u32 %s223_s10, 4  ;;  %s337_s26 = scalar_lea.sflag [#allocation5], %s885_s19  ;;  %s913_s11 = int_to_ptr.vmem [resolvable:$true] %s350_s11 }
  0x5e   : > { %476 = vmatpush3.bf16.msra.mxu0 %v475_v5  ;;  %s619_s7 = scalar_lea.vmem %s913_s11, 128  ;;  %s715_s15 = smov [#allocation8]  }
  0x5f   : > { %477 = vmatprep.subr.bf16.mxu0 %v711_v0  ;;  %p620_p4 = scmp.ne.s32.totalorder %s913_s11, %s619_s7  ;;  %s623_s8 = sshll.u32 %s715_s15, 4  ;;  %s624_s8 = int_to_ptr.vmem [resolvable:$false] %s623_s8 }
  0x60   : > { %s625_s21 = scalar_lea.vmem %s624_s8, 256  ;;  %p626_p12 = scmp.lt.s32.totalorder %s913_s11, %s624_s8 }
  0x61   : > { %p621_p6 = pnand %p620_p4, %p832_p10  ;;  %p627_p11 = scmp.lt.s32.totalorder %s625_s21, %s619_s7 }
  0x62   : > { %479 = vmatpush3.bf16.msra.mxu0 %v478_v8 }
  0x63   : > { %p622_p8 = pneg %p621_p6  ;;  %p628_p0 = por %p627_p11, %p626_p12 }
  0x64   : > { %v238_v10 = vld [vmem:[#allocation2] sm:$0xff] }
  0x65   : > { %472 = vmatmul.mubr.msk.f32.vlgmr.msra.gmra.mrb[0].mxu0 %vm244_vm2, %v239_v9  ;;  %p629_p5 = pnand %p628_p0, %p622_p8 }
 0x138   : > { %v314_v11 = vpop.f32.mrb[0].mxu0 }
 0x139   : > { %v318_v12 = vadd.f32 %v314_v11, %v238_v10  ;;  %v473_v13 = vpop.f32.mrb[1].mxu0 }
 0x13b   : > { %320 = vst.msk [vmem:[#allocation2] sm:$0xff] %vm236_vm1, %v318_v12 }
 0x142   : > { %v324_v14 = vld [vmem:[#allocation2] sm:$0xff] }
 0x143   : > { %v326_v15 = vmul.f32 0.70710677, %v324_v14  ;;  %v325_v17 = vmul.f32 0.5, %v324_v14 }
 0x145   : > { %559 = verf.f32 %v326_v15 }
 0x14f   : > { %v560_v16 = vpop.eup %559 }
 0x150   : > { %v328_v18 = vadd.f32 1.0, %v560_v16 }
 0x152   : > { %v329_v19 = vmul.f32 %v328_v18, %v325_v17 }
 0x154   : > { %331 = vrot.lane.b32.xlu0 %v329_v19, %s714_s20 }
 0x1c6   : > { %v332_v20 = vpop.permute.xlu0 %331 }
 0x1c7   : > { %v334_v21 = vmul.f32 %v332_v20, %v324_v14 }
 0x1c9   : > { %335 = vst.msk [vmem:[%s223_s10] sm:$0xff] %vm244_vm2, %v334_v21 }
 0x1ca   : > { %632 = shalt.err (!%p629_p5)
}
 0x1cb   : > { %s633_s19 = scalar_lea.hbm %s911_s6, 128  ;;  %s637_s4 = scalar_lea.hbm %s964_s3, 256 }
 0x1cc   : > { %p634_p9 = scmp.ne.s32.totalorder %s911_s6, %s633_s19  ;;  %p638_p7 = scmp.lt.u32.totalorder %s911_s6, %s964_s3 }
 0x1cd   : > { %p639_p3 = scmp.lt.u32.totalorder %s637_s4, %s633_s19  ;;  %p641_p4 = scmp.lt.u32.totalorder %s633_s19, %s911_s6 }
 0x1ce   : > { %p635_p1 = pnand %p634_p9, %p832_p10 }
 0x1cf   : > { %p640_p13 = por %p639_p3, %p638_p7 }
 0x1d0   : > { %p636_p2 = pneg %p635_p1 }
 0x1d1   : > { %p642_p6 = por %p641_p4, %p640_p13 }
 0x1d3   : > { %p643_p8 = pnand %p642_p6, %p636_p2 }
 0x1d5   : > { %646 = shalt.err (!%p643_p8)
}
 0x1d6   : > { %486 = dma.vmem_to_hbm [thread:$0]  (%p832_p10), %s913_s11, 128, %s911_s6, %s337_s26  }
 0x1d7 PF: > { %s362_s20 = sand.u32 1, %s685_s12   ;;  %p982_p12 = scmp.ne.s32.totalorder %s972_s23, 0 }
 0x1d8   : > { %p983_p11 = scmp.ge.s32.totalorder %s705_s17, 2  ;;  %s363_s9 = scalar_lea.sflag [#allocation5], %s362_s20 }
 0x1da   : > { %p497_p0 = pnand %p983_p11, %p982_p12 }
 0x1dc   : > { %680 = dma.done.wait (!%p497_p0), %s363_s9, 128  }
 0x1dd   : > { %682 = vsyncadd (!%p497_p0), %s363_s9, 4294967168  ;;  %s20_s17 = sadd.s32 1, %s705_s17   ;;  %s984_s12 = smov %s689_s13 }
 0x1de   : > { %p17_p5 = scmp.ge.s32.totalorder %s20_s17, 4   ;;  %s985_s13 = smov %s693_s14 }
 0x1df   : > { %s986_s14 = smov %s841_s5  ;;  %s987_s15 = smov %s701_s16 }
 0x1e0   : > { %s988_s16 = smov %s990_s28  ;;  %19 = sbr.rel (!%p17_p5) target bundleno = 7 (0x7), region = 90 }
 0x1e7   :  { %368 = vsyncpa [#allocation4], 1 }
 0x1e8   :  { %370 = vsyncpa [#allocation4 + $0x1], 1 }
 0x1e9   :  { %371 = vsyncpa [#allocation7], 1 }
 0x1ea   :  { %372 = vsyncpa [#allocation5], 1 }
 0x1eb   :  { %374 = vsyncpa [#allocation5 + $0x1], 1 }

</bundles_post_ra>
